<compile_context>
chip_gen: v7x
topology: tpu7x:2x2x1
jax: 0.10.0
libtpu: 0.0.40
codegen_flags: <defaults>
</compile_context>

<pallas_src>
import functools

import jax
import jax.numpy as jnp
import numpy as np
from jax import lax
from jax.experimental import pallas as pl
from jax.experimental.pallas import tpu as pltpu

_LANE = 128
_MXU_MIN_OBJECTS = 32        # below this the MXU is <~2% utilized -> VPU broadcast-FMA


def _hw_budgets():
    """(per-step in+out byte budget, vmem_limit_bytes), derived from physical VMEM."""
    cap = 64 * 1024 * 1024                       # conservative fallback (v7x per-TC VMEM)
    try:
        info = pltpu.get_tpu_info()
        cap = int(getattr(info, "vmem_capacity_bytes", cap) or cap)
    except Exception:
        pass
    vmem_limit = int(min(cap * 3 // 4, 96 * 1024 * 1024))   # v7x: 48 MiB, v5e/v6e: 96 MiB
    step_budget = vmem_limit // 4                            # x2 for in+out, x2 double-buffer
    return step_budget, vmem_limit


def _choose_tiling(B, C, HW, itemsize, step_budget):
    """Pick (batch_block Bt, spatial_tile T, n_spatial_tiles), padding-corrected."""
    sub = 8 if itemsize >= 4 else (16 if itemsize == 2 else 32)
    c_pad = -(-C // sub) * sub                   # physical sublanes occupied by the C axis
    hw128 = -(-HW // _LANE) * _LANE

    # --- spatial tile first: maximize T within the budget at Bt = 1 ---
    bytes_per_lane = 2 * c_pad * itemsize        # in + out, one lane column, Bt = 1
    max_lanes = max(_LANE, (step_budget // bytes_per_lane) // _LANE * _LANE)
    if hw128 <= max_lanes:
        T, n_hw = HW, 1                          # full spatial extent in one block (full-dim
                                                 # block is exempt from the 128 constraint)
    else:
        n_hw = -(-hw128 // max_lanes)
        T = -(-hw128 // (n_hw * _LANE)) * _LANE  # balanced, lane-dense (multiple of 128)
        n_hw = -(-HW // T)                       # ragged last block handled by Pallas masking
    t_phys = -(-T // _LANE) * _LANE              # lane padding of a full-dim block in VMEM

    # --- then batch block: largest divisor of B that fits the (padded) budget, preferring
    #     an even grid-step count >= 2 (v7x dual-TensorCore load balance) ---
    best_bt, best_key = 1, None
    for bt in range(1, B + 1):
        if B % bt:
            continue
        step_bytes = 2 * bt * c_pad * t_phys * itemsize
        if bt > 1 and step_bytes > step_budget:
            continue
        n_steps = (B // bt) * n_hw
        key = (n_steps >= 2 and n_steps % 2 == 0, n_steps >= 2, bt)
        if best_key is None or key > best_key:
            best_bt, best_key = bt, key
    return best_bt, T, n_hw


def _prioritize_kernel(w_ref, x_ref, o_ref, *, num_objects, use_mxu):
    """One (Bt, C, T) tile: out = relu(w' @ x); w' = I - sigmoid-weights (diag folded in)."""
    x = x_ref[...]                               # (Bt, C, T)
    w = w_ref[...]                               # (Bt, C, C) float32

    if use_mxu:
        if x.dtype == jnp.bfloat16:
            out = jnp.einsum("boi,bit->bot", w.astype(jnp.bfloat16), x,
                             preferred_element_type=jnp.float32)
        else:
            out = jnp.einsum("boi,bit->bot", w, x.astype(jnp.float32),
                             preferred_element_type=jnp.float32,
                             precision=lax.Precision.HIGHEST)
    else:
        # Small O: VPU broadcast-FMA unrolled over source objects (MXU would be ~idle).
        # TODO(synk): source the x broadcast via a stride-0 sublane load from x_ref if a
        # mid-size C ever makes the XLU/VALU (rather than HBM) the binding unit.
        xf = x.astype(jnp.float32)
        acc = w[:, :, 0:1] * xf[:, 0:1, :]
        for i in range(1, num_objects):
            acc = acc + w[:, :, i:i + 1] * xf[:, i:i + 1, :]
        out = acc

    o_ref[...] = jnp.maximum(out, 0.0).astype(o_ref.dtype)


def prioritize(x, priority, num_objects):
    """x: (B, num_objects, H, W), priority: (B, num_objects) or None."""
    if priority is None:
        return x
    B, C, H, W = x.shape
    assert C == num_objects, "channel dim must equal num_objects (as in the PyTorch conv)"
    HW = H * W

    # Hoisted weight computation: w'[b,o,i] = I[o,i] - sigmoid(p_i - p_o) * (1 - I[o,i]).
    p = priority.astype(jnp.float32)
    sig = jax.nn.sigmoid(p[:, None, :] - p[:, :, None])        # sig[b, o, i]
    eye = jnp.eye(C, dtype=jnp.float32)
    w = eye[None, :, :] - sig * (1.0 - eye)[None, :, :]        # (B, C, C)

    itemsize = jnp.dtype(x.dtype).itemsize
    step_budget, vmem_limit = _hw_budgets()
    Bt, T, n_hw = _choose_tiling(B, C, HW, itemsize, step_budget)

    x_flat = x.reshape(B, C, HW)                 # no pad: ragged last block handled by Pallas

    kernel = functools.partial(
        _prioritize_kernel,
        num_objects=num_objects,
        use_mxu=num_objects >= _MXU_MIN_OBJECTS,
    )

    out_flat = pl.pallas_call(
        kernel,
        out_shape=jax.ShapeDtypeStruct((B, C, HW), x.dtype),
        grid_spec=pltpu.PrefetchScalarGridSpec(
            num_scalar_prefetch=0,
            grid=(B // Bt, n_hw),
            in_specs=[
                pl.BlockSpec((Bt, C, C), lambda b, s: (b, 0, 0)),   # per-batch weights
                pl.BlockSpec((Bt, C, T), lambda b, s: (b, 0, s)),   # input tile
            ],
            out_specs=pl.BlockSpec((Bt, C, T), lambda b, s: (b, 0, s)),
        ),
        compiler_params=pltpu.CompilerParams(
            dimension_semantics=("parallel", "parallel"),
            vmem_limit_bytes=vmem_limit,
        ),
    )(w, x_flat)

    return out_flat.reshape(B, C, H, W)


def _reference(x, priority):
    # Pure-JAX reference mirroring the PyTorch code.
    B, C, H, W = x.shape
    wts = jax.nn.sigmoid(priority[:, None, :] - priority[:, :, None])   # (B, O, O)
    wts = jnp.where(jnp.eye(C, dtype=bool)[None], 0.0, wts)
    conv = jnp.einsum("boi,bihw->bohw", wts, x)
    return jnp.maximum(x - conv, 0.0)


if __name__ == "__main__":
    B, num_objects = 2, 4
    key = jax.random.PRNGKey(0)
    kx, kp, kx2 = jax.random.split(key, 3)
    priority = jax.random.normal(kp, (B, num_objects), dtype=jnp.float32)

    # Case 1: H*W a multiple of 128.
    x = jax.random.normal(kx, (B, num_objects, 16, 16), dtype=jnp.float32)
    out = jax.block_until_ready(prioritize(x, priority, num_objects))
    np.testing.assert_allclose(np.asarray(out), np.asarray(_reference(x, priority)),
                               rtol=1e-5, atol=1e-5)

    # Case 2: ragged H*W (10*10 = 100, not a multiple of 128) -> full-dim spatial block,
    # no wrapper-side padding.
    x2 = jax.random.normal(kx2, (B, num_objects, 10, 10), dtype=jnp.float32)
    out2 = jax.block_until_ready(prioritize(x2, priority, num_objects))
    np.testing.assert_allclose(np.asarray(out2), np.asarray(_reference(x2, priority)),
                               rtol=1e-5, atol=1e-5)

    # priority=None pass-through (module semantics).
    assert prioritize(x, None, num_objects) is x

    print("KERNEL_OK")
</pallas_src>

<mosaic_0001>
module attributes {stable_mosaic.version = 11 : i64} {
  func.func @_prioritize_kernel(%arg0: i32, %arg1: i32, %arg2: memref<1x4x4xf32, #tpu.memory_space<vmem>>, %arg3: memref<1x4x256xf32, #tpu.memory_space<vmem>>, %arg4: memref<1x4x256xf32, #tpu.memory_space<vmem>>) attributes {dimension_semantics = [#tpu.dimension_semantics<parallel>, #tpu.dimension_semantics<parallel>], iteration_bounds = array<i64: 2, 1>, scalar_prefetch = 0 : i64, scratch_operands = 0 : i64, tpu.core_type = #tpu.core_type<tc>, window_params = [{transform_indices = @transform_0, window_bounds = array<i64: 1, 4, 4>}, {transform_indices = @transform_1, window_bounds = array<i64: 1, 4, 256>}, {transform_indices = @transform_2, window_bounds = array<i64: 1, 4, 256>}]} {
    %c0 = arith.constant 0 : index
    %c0_0 = arith.constant 0 : index
    %c0_1 = arith.constant 0 : index
    %0 = vector.load %arg3[%c0, %c0_0, %c0_1] : memref<1x4x256xf32, #tpu.memory_space<vmem>>, vector<1x4x256xf32>
    %c0_2 = arith.constant 0 : index
    %c0_3 = arith.constant 0 : index
    %c0_4 = arith.constant 0 : index
    %1 = vector.load %arg2[%c0_2, %c0_3, %c0_4] : memref<1x4x4xf32, #tpu.memory_space<vmem>>, vector<1x4x4xf32>
    %2 = vector.extract_strided_slice %1 {offsets = [0, 0, 0], sizes = [1, 4, 1], strides = [1, 1, 1]} : vector<1x4x4xf32> to vector<1x4x1xf32>
    %3 = vector.extract_strided_slice %0 {offsets = [0, 0, 0], sizes = [1, 1, 256], strides = [1, 1, 1]} : vector<1x4x256xf32> to vector<1x1x256xf32>
    %4 = vector.broadcast %2 : vector<1x4x1xf32> to vector<1x4x256xf32>
    %5 = vector.broadcast %3 : vector<1x1x256xf32> to vector<1x4x256xf32>
    %6 = arith.mulf %4, %5 : vector<1x4x256xf32>
    %7 = vector.extract_strided_slice %1 {offsets = [0, 0, 1], sizes = [1, 4, 1], strides = [1, 1, 1]} : vector<1x4x4xf32> to vector<1x4x1xf32>
    %8 = vector.extract_strided_slice %0 {offsets = [0, 1, 0], sizes = [1, 1, 256], strides = [1, 1, 1]} : vector<1x4x256xf32> to vector<1x1x256xf32>
    %9 = vector.broadcast %7 : vector<1x4x1xf32> to vector<1x4x256xf32>
    %10 = vector.broadcast %8 : vector<1x1x256xf32> to vector<1x4x256xf32>
    %11 = arith.mulf %9, %10 : vector<1x4x256xf32>
    %12 = arith.addf %6, %11 : vector<1x4x256xf32>
    %13 = vector.extract_strided_slice %1 {offsets = [0, 0, 2], sizes = [1, 4, 1], strides = [1, 1, 1]} : vector<1x4x4xf32> to vector<1x4x1xf32>
    %14 = vector.extract_strided_slice %0 {offsets = [0, 2, 0], sizes = [1, 1, 256], strides = [1, 1, 1]} : vector<1x4x256xf32> to vector<1x1x256xf32>
    %15 = vector.broadcast %13 : vector<1x4x1xf32> to vector<1x4x256xf32>
    %16 = vector.broadcast %14 : vector<1x1x256xf32> to vector<1x4x256xf32>
    %17 = arith.mulf %15, %16 : vector<1x4x256xf32>
    %18 = arith.addf %12, %17 : vector<1x4x256xf32>
    %19 = vector.extract_strided_slice %1 {offsets = [0, 0, 3], sizes = [1, 4, 1], strides = [1, 1, 1]} : vector<1x4x4xf32> to vector<1x4x1xf32>
    %20 = vector.extract_strided_slice %0 {offsets = [0, 3, 0], sizes = [1, 1, 256], strides = [1, 1, 1]} : vector<1x4x256xf32> to vector<1x1x256xf32>
    %21 = vector.broadcast %19 : vector<1x4x1xf32> to vector<1x4x256xf32>
    %22 = vector.broadcast %20 : vector<1x1x256xf32> to vector<1x4x256xf32>
    %23 = arith.mulf %21, %22 : vector<1x4x256xf32>
    %24 = arith.addf %18, %23 : vector<1x4x256xf32>
    %cst = arith.constant 0.000000e+00 : f32
    %25 = vector.broadcast %cst : f32 to vector<1x4x256xf32>
    %26 = arith.maximumf %24, %25 : vector<1x4x256xf32>
    %c0_5 = arith.constant 0 : index
    %c0_6 = arith.constant 0 : index
    %c0_7 = arith.constant 0 : index
    %27 = vector.load %arg4[%c0_5, %c0_6, %c0_7] : memref<1x4x256xf32, #tpu.memory_space<vmem>>, vector<1x4x256xf32>
    tpu.vector_store %arg4[%c0_5, %c0_6, %c0_7], %26 {strides = array<i32>} : memref<1x4x256xf32, #tpu.memory_space<vmem>>, vector<1x4x256xf32>,
    return
  }
  func.func @transform_0(%arg0: i32, %arg1: i32) -> (i32, i32, i32) {
    %c0_i32 = arith.constant 0 : i32
    %c0_i32_0 = arith.constant 0 : i32
    %c0_i32_1 = arith.constant 0 : i32
    return %arg0, %c0_i32, %c0_i32_0 : i32, i32, i32
  }
  func.func @transform_1(%arg0: i32, %arg1: i32) -> (i32, i32, i32) {
    %c0_i32 = arith.constant 0 : i32
    %c0_i32_0 = arith.constant 0 : i32
    return %arg0, %c0_i32, %arg1 : i32, i32, i32
  }
  func.func @transform_2(%arg0: i32, %arg1: i32) -> (i32, i32, i32) {
    %c0_i32 = arith.constant 0 : i32
    %c0_i32_0 = arith.constant 0 : i32
    return %arg0, %c0_i32, %arg1 : i32, i32, i32
  }
}

</mosaic_0001>

<bundles_post_ra>
// kernel: tpu_custom_call.1
= control target key start
LH: loop header
LB: loop body
LE: loop exit
PB: predicated region body
PF: predicated region fallthrough
CT: control target
= control target key end

     0   :  { %7 = vsyncpa [#allocation3], 0  ;;  %s939_s0 = inlined_call_operand.hbm [shape: f32[2,4,4], index: 0, kind: input, shape index: {}]   ;;  %s940_s1 = inlined_call_operand.hbm [shape: f32[2,4,256], index: 1, kind: input, shape index: {}]   ;;  %s941_s2 = inlined_call_operand.hbm [shape: f32[2,4,256], index: 2, kind: output, shape index: {}]  }
   0x1   :  { %9 = vsyncpa [#allocation3 + $0x1], 0 }
   0x2   :  { %10 = vsyncpa [#allocation6], 0 }
   0x3   :  { %12 = vsyncpa [#allocation6 + $0x1], 0 }
   0x4   :  { %13 = vsyncpa [#allocation4], 0 }
   0x5   :  { %15 = vsyncpa [#allocation4 + $0x1], 0  ;;  %s720_s9 = smov 0   ;;  %s722_s10 = smov 0  }
   0x6   :  { %s724_s11 = smov 0   ;;  %s726_s12 = smov 0  }
   0x7   :  { %s728_s13 = smov 0   ;;  %s730_s14 = smov 0  }
   0x8 LB: > { %s454_s15 = sadd.s32 4294967295, %s696_s14   ;;  %s455_s16 = sadd.s32 4294967294, %s696_s14   ;;  %s696_s14 = sphi %s730_s14, %s21_s14   ;;  %s692_s13 = sphi %s728_s13, %s961_s13   ;;  %s688_s12 = sphi %s726_s12, %s960_s12   ;;  %s684_s11 = sphi %s724_s11, %s959_s11   ;;  %s680_s10 = sphi %s722_s10, %s958_s10   ;;  %s676_s9 = sphi %s720_s9, %s957_s9  }
   0x9   : > { %s33_s17 = sadd.s32 1, %s692_s13  ;;  %s40_s18 = sadd.s32 1, %s684_s11 }
   0xa   : > { %p35_p0 = scmp.ge.s32.totalorder %s33_s17, 2  ;;  %p47_p1 = scmp.ne.s32.totalorder %s684_s11, %s680_s10 }
   0xb   : > { %p48_p2 = scmp.eq.s32.totalorder %s696_s14, 0  ;;  %p53_p3 = scmp.ne.s32.totalorder %s680_s10, %s676_s9 }
   0xc   : > { %s963_s17 = smov (%p35_p0, %s33_s17), 0  ;;  %p54_p5 = scmp.eq.s32.totalorder %s454_s15, 0 }
   0xd   : > { %p761_p4 = por %p48_p2, %p47_p1  ;;  %s37_s20 = ssub.s32 %s692_s13, %s963_s17 }
   0xe   : > { %p107_p6 = scmp.eq.s32.totalorder %s454_s15, 1  ;;  %p38_p7 = scmp.eq.s32.totalorder %s37_s20, 0 }
   0xf   : > { %p767_p8 = por %p54_p5, %p53_p3  ;;  %p113_p10 = scmp.eq.s32.totalorder %s455_s16, 1 }
  0x10   : > { %p771_p9 = por %p107_p6, %p47_p1  ;;  %p491_p13 = scmp.lt.s32.totalorder %s696_s14, 2 }
  0x11   : > { %s945_s21 = scalar_select %p767_p8, 1, 0 }
  0x12   : > { %s946_s22 = scalar_select %p771_p9, 1, 0 }
  0x13   : > { %s776_s23 = scalar_select %p38_p7, %s684_s11, %s40_s18  }
  0x14   : > { %p778_p11 = por %p113_p10, %p53_p3  ;;  %s785_s25 = sand.u32 1, %s684_s11  }
  0x15   : > { %s458_s26 = sshll.u32 %s785_s25, 2  ;;  %s459_s27 = sshll.u32 %s692_s13, 6 }
  0x16   : > { %s947_s24 = scalar_select %p778_p11, 1, 0 }
  0x17   : > { %s792_s30 = scalar_lea.hbm %s939_s0, %s459_s27  ;;  %s137_s3 = scalar_lea.vmem [#allocation2], %s458_s26 }
  0x18   : > { %s144_s4 = sshll.u32 %s137_s3, 4  ;;  %p798_p0 = pnand %p491_p13, %p761_p4  ;;  %s794_s4 = int_to_ptr.vmem [resolvable:$true] %s144_s4 }
  0x19   : > { %s134_s6 = scalar_lea.sflag [#allocation3], %s785_s25  ;;  %s550_s7 = scalar_lea.hbm %s792_s30, 64 }
  0x1a   : > { %p551_p3 = scmp.ne.s32.totalorder %s792_s30, %s550_s7  ;;  %p552_p5 = pneg %p798_p0 }
  0x1b   : > { %s555_s16 = scalar_lea.hbm %s939_s0, 128  ;;  %p556_p4 = scmp.lt.u32.totalorder %s792_s30, %s939_s0 }
  0x1c   : > { %p553_p6 = pnand %p552_p5, %p551_p3  ;;  %p557_p10 = scmp.lt.u32.totalorder %s555_s16, %s550_s7 }
  0x1d   : > { %p559_p12 = scmp.lt.u32.totalorder %s550_s7, %s792_s30 }
  0x1e   : > { %p554_p7 = pneg %p553_p6  ;;  %p558_p13 = por %p557_p10, %p556_p4 }
  0x20   : > { %p560_p1 = por %p559_p12, %p558_p13 }
  0x22   : > { %p561_p2 = pnand %p560_p1, %p554_p7 }
  0x24   : > { %564 = shalt.err (!%p561_p2)
}
  0x25   : > { %s565_s20 = scalar_lea.vmem %s794_s4, 64  ;;  %s698_s26 = smov [#allocation2]  }
  0x26   : > { %p566_p3 = scmp.ne.s32.totalorder %s794_s4, %s565_s20  ;;  %s570_s27 = sshll.u32 %s698_s26, 4  ;;  %s571_s27 = int_to_ptr.vmem [resolvable:$false] %s570_s27 }
  0x27   : > { %s572_s28 = scalar_lea.vmem %s571_s27, 128  ;;  %p573_p9 = scmp.lt.s32.totalorder %s794_s4, %s571_s27 }
  0x28   : > { %p568_p6 = pnand %p566_p3, %p552_p5  ;;  %p574_p4 = scmp.lt.s32.totalorder %s572_s28, %s565_s20 }
  0x2a   : > { %p569_p11 = pneg %p568_p6  ;;  %p575_p10 = por %p574_p4, %p573_p9 }
  0x2c   : > { %p576_p12 = pnand %p575_p10, %p569_p11 }
  0x2e   : > { %579 = shalt.err (!%p576_p12)
}
  0x2f   : > { %483 = dma.hbm_to_vmem [thread:$0]  (!%p798_p0), %s792_s30, 64, %s794_s4, %s134_s6  }
  0x30   : > { %p949_p1 = scmp.lt.s32.totalorder %s696_s14, 3  ;;  %p950_p2 = scmp.ge.s32.totalorder %s696_s14, 1 }
  0x31   : > { %s460_s3 = sshll.u32 %s785_s25, 3  ;;  %s472_s7 = sshll.u32 %s692_s13, 7 }
  0x32   : > { %p834_p7 = pnand %p950_p2, %p949_p1  ;;  %s843_s16 = scalar_lea.hbm %s940_s1, %s472_s7 }
  0x33   : > { %s155_s18 = scalar_lea.vmem [#allocation5], %s460_s3  ;;  %s152_s30 = scalar_lea.sflag [#allocation6], %s785_s25 }
  0x34   : > { %s951_s29 = scalar_select %p834_p7, 1, 0 }
  0x35   : > { %s165_s19 = sshll.u32 %s155_s18, 4  ;;  %s580_s4 = scalar_lea.hbm %s843_s16, 128  ;;  %s166_s19 = int_to_ptr.vmem [resolvable:$true] %s165_s19 }
  0x36   : > { %p581_p9 = scmp.ne.s32.totalorder %s843_s16, %s580_s4  ;;  %s585_s26 = scalar_lea.hbm %s940_s1, 256 }
  0x37   : > { %p586_p3 = scmp.lt.u32.totalorder %s843_s16, %s940_s1  ;;  %p587_p6 = scmp.lt.u32.totalorder %s585_s26, %s580_s4 }
  0x38   : > { %p583_p11 = pnand %p581_p9, %p552_p5  ;;  %p589_p10 = scmp.lt.u32.totalorder %s580_s4, %s843_s16 }
  0x39   : > { %p588_p4 = por %p587_p6, %p586_p3 }
  0x3a   : > { %p584_p13 = pneg %p583_p11 }
  0x3b   : > { %p590_p12 = por %p589_p10, %p588_p4 }
  0x3d   : > { %p591_p1 = pnand %p590_p12, %p584_p13 }
  0x3f   : > { %594 = shalt.err (!%p591_p1)
}
  0x40   : > { %s595_s25 = scalar_lea.vmem %s166_s19, 128  ;;  %s699_s3 = smov [#allocation5]  }
  0x41   : > { %p596_p2 = scmp.ne.s32.totalorder %s166_s19, %s595_s25  ;;  %s600_s7 = sshll.u32 %s699_s3, 4  ;;  %s601_s7 = int_to_ptr.vmem [resolvable:$false] %s600_s7 }
  0x42   : > { %s602_s8 = scalar_lea.vmem %s601_s7, 256  ;;  %p603_p8 = scmp.lt.s32.totalorder %s166_s19, %s601_s7 }
  0x43   : > { %p598_p9 = pnand %p596_p2, %p552_p5  ;;  %p604_p7 = scmp.lt.s32.totalorder %s602_s8, %s595_s25 }
  0x45   : > { %p599_p11 = pneg %p598_p9  ;;  %p605_p3 = por %p604_p7, %p603_p8 }
  0x47   : > { %p606_p6 = pnand %p605_p3, %p599_p11 }
  0x49   : > { %609 = shalt.err (!%p606_p6)
}
  0x4a   : > { %486 = dma.hbm_to_vmem [thread:$0]  (!%p798_p0), %s843_s16, 128, %s166_s19, %s152_s30  }
  0x4b   : > { %p952_p13 = scmp.ne.s32.totalorder %s951_s29, 0 }
  0x4c   : > { %s868_s15 = sand.u32 (!%p952_p13), 1, %s680_s10   ;;  %p953_p5 = scmp.ne.s32.totalorder (!%p952_p13), %s945_s21, 0 }
  0x4d   : > { %174 = sbr.rel (%p952_p13) target bundleno = 249 (0xf9), region = 28  ;;  %s464_s18 = sshll.u32 (!%p952_p13), %s868_s15, 2 }
  0x4e   : > { %s177_s4 = scalar_lea.sflag (!%p952_p13), [#allocation3], %s868_s15  ;;  %s180_s6 = scalar_lea.vmem (!%p952_p13), [#allocation2], %s464_s18 }
  0x54   : > { %663 = dma.done.wait (%p953_p5), %s177_s4, 64  }
  0x55   : > { %665 = vsyncadd (%p953_p5), %s177_s4, 4294967232  ;;  %s465_s5 = sshll.u32 %s868_s15, 3  ;;  %s186_s29 = scalar_lea.sflag [#allocation6], %s868_s15 }
  0x56   : > { %s189_s16 = scalar_lea.vmem [#allocation5], %s465_s5 }
  0x57   : > { %667 = dma.done.wait (%p953_p5), %s186_s29, 128  }
  0x58   : > { %669 = vsyncadd (%p953_p5), %s186_s29, 4294967168  ;;  %v700_v0 = vmov 0   ;;  %v701_v1 = vmov 2   ;;  %v218_v2 = vld [vmem:[%s180_s6] sm:$0xf]  ;;  %v702_v3 = vmov 1   ;;  %v225_v5 = vlaneseq }
  0x59   : > { %545 = vset.pattern.permute.xlu0 %v700_v0  ;;  %547 = vset.pattern.permute.xlu1 %v701_v1  ;;  %v703_v4 = vmov 3   ;;  %v217_v11 = vld [vmem:[%s189_s16] sm:$0xff]  ;;  %s473_s21 = sshll.u32 %s688_s12, 7  ;;  %s214_s19 = scalar_lea.vmem [#allocation7], %s465_s5 }
  0x5a   : > { %221 = vperm.xlu0 %545, %v218_v2   ;;  %272 = vperm.xlu1 %547, %v218_v2   ;;  %v226_v6 = vshrl.u32 %v225_v5, 7  ;;  %s347_s30 = sshll.u32 %s214_s19, 4  ;;  %s890_s27 = scalar_lea.hbm %s941_s2, %s473_s21  ;;  %s892_s30 = int_to_ptr.vmem [resolvable:$true] %s347_s30 }
  0x5b   : > { %s331_s28 = scalar_lea.sflag [#allocation4], %s868_s15  ;;  %s610_s25 = scalar_lea.vmem %s892_s30, 128 }
  0x5c   : > { %v227_v7 = vsub.s32 0, %v226_v6  ;;  %v231_v8 = vsub.s32 4, %v226_v6  ;;  %v251_v9 = vsub.s32 1, %v226_v6  ;;  %v255_v10 = vsub.s32 5, %v226_v6  ;;  %p611_p8 = scmp.ne.s32.totalorder %s892_s30, %s610_s25  ;;  %p954_p0 = scmp.ne.s32.totalorder %s946_s22, 0 }
  0x5d   : > { %v277_v12 = vsub.s32 2, %v226_v6  ;;  %v281_v13 = vsub.s32 6, %v226_v6  ;;  %v303_v14 = vsub.s32 3, %v226_v6  ;;  %v307_v15 = vsub.s32 7, %v226_v6  ;;  %s704_s12 = smov [#allocation7]  }
  0x5e   : > { %546 = vset.pattern.permute.xlu0 %v702_v3  ;;  %548 = vset.pattern.permute.xlu1 %v703_v4  ;;  %v228_v16 = vrot.slane %v217_v11, %v227_v7  ;;  %v232_v17 = vrot.slane %v217_v11, %v231_v8  ;;  %v252_v18 = vrot.slane %v217_v11, %v251_v9  ;;  %p612_p7 = pnand %p611_p8, %p954_p0  ;;  %s614_s3 = sshll.u32 %s704_s12, 4  ;;  %s615_s3 = int_to_ptr.vmem [resolvable:$false] %s614_s3 }
  0x5f   : > { %246 = vperm.xlu0 %546, %v218_v2   ;;  %298 = vperm.xlu1 %548, %v218_v2   ;;  %v256_v19 = vrot.slane %v217_v11, %v255_v10  ;;  %v278_v20 = vrot.slane %v217_v11, %v277_v12  ;;  %v282_v21 = vrot.slane %v217_v11, %v281_v13  ;;  %s616_s7 = scalar_lea.vmem %s615_s3, 256  ;;  %p617_p10 = scmp.lt.s32.totalorder %s892_s30, %s615_s3 }
  0x60   : > { %v304_v24 = vrot.slane %v217_v11, %v303_v14  ;;  %v308_v25 = vrot.slane %v217_v11, %v307_v15  ;;  %v238_v26 = vrot.slane %v228_v16, %v227_v7  ;;  %v242_v27 = vrot.slane %v232_v17, %v227_v7  ;;  %p613_p4 = pneg %p612_p7  ;;  %p618_p12 = scmp.lt.s32.totalorder %s616_s7, %s610_s25 }
  0x61   : > { %v262_v28 = vrot.slane %v252_v18, %v251_v9  ;;  %v266_v29 = vrot.slane %v256_v19, %v251_v9  ;;  %v288_v30 = vrot.slane %v278_v20, %v277_v12  ;;  %v292_v31 = vrot.slane %v282_v21, %v277_v12 }
  0x62   : > { %v314_v32 = vrot.slane %v304_v24, %v303_v14  ;;  %v318_v33 = vrot.slane %v308_v25, %v303_v14  ;;  %p619_p1 = por %p618_p12, %p617_p10 }
  0x63   : > { %549 = vset.pattern.permute.xlu0 %v703_v4 }
  0x64   : > { %p620_p2 = pnand %p619_p1, %p613_p4 }
  0xd9   : > { %v222_v22 = vpop.permute.xlu0 %221  ;;  %v273_v23 = vpop.permute.xlu1 %272 }
  0xda   : > { %v243_v36 = vmul.f32 %v238_v26, %v222_v22  ;;  %v244_v37 = vmul.f32 %v242_v27, %v222_v22  ;;  %v293_v40 = vmul.f32 %v288_v30, %v273_v23  ;;  %v294_v41 = vmul.f32 %v292_v31, %v273_v23 }
  0xde   : > { %v247_v34 = vpop.permute.xlu0 %246  ;;  %v299_v35 = vpop.permute.xlu1 %298 }
  0xdf   : > { %v267_v38 = vmul.f32 %v262_v28, %v247_v34  ;;  %v268_v39 = vmul.f32 %v266_v29, %v247_v34  ;;  %v319_v44 = vmul.f32 %v314_v32, %v299_v35  ;;  %v320_v45 = vmul.f32 %v318_v33, %v299_v35 }
  0xe1   : > { %v269_v42 = vadd.f32 %v267_v38, %v243_v36  ;;  %v270_v43 = vadd.f32 %v268_v39, %v244_v37 }
  0xe3   : > { %v295_v46 = vadd.f32 %v293_v40, %v269_v42  ;;  %v296_v47 = vadd.f32 %v294_v41, %v270_v43 }
  0xe5   : > { %v321_v48 = vadd.f32 %v319_v44, %v295_v46  ;;  %v322_v49 = vadd.f32 %v320_v45, %v296_v47 }
  0xe7   : > { %v323_v50 = vmax.f32 %v321_v48, 0.0  ;;  %v324_v51 = vmax.f32 %v322_v49, 0.0 }
  0xe9   : > { %v327_v52 = vcombine.low %v323_v50, %v324_v51 }
  0xeb   : > { %329 = vst [vmem:[%s214_s19] sm:$0xff] %v327_v52 }
  0xec   : > { %623 = shalt.err (!%p620_p2)
}
  0xed   : > { %s624_s8 = scalar_lea.hbm %s890_s27, 128  ;;  %s628_s4 = scalar_lea.hbm %s941_s2, 256 }
  0xee   : > { %p625_p9 = scmp.ne.s32.totalorder %s890_s27, %s624_s8  ;;  %p629_p6 = scmp.lt.u32.totalorder %s890_s27, %s941_s2 }
  0xef   : > { %p630_p13 = scmp.lt.u32.totalorder %s628_s4, %s624_s8  ;;  %p632_p8 = scmp.lt.u32.totalorder %s624_s8, %s890_s27 }
  0xf0   : > { %p626_p11 = pnand %p625_p9, %p954_p0 }
  0xf1   : > { %p631_p5 = por %p630_p13, %p629_p6 }
  0xf2   : > { %p627_p3 = pneg %p626_p11 }
  0xf3   : > { %p633_p7 = por %p632_p8, %p631_p5 }
  0xf5   : > { %p634_p4 = pnand %p633_p7, %p627_p3 }
  0xf7   : > { %637 = shalt.err (!%p634_p4)
}
  0xf8   : > { %478 = dma.vmem_to_hbm [thread:$0]  (%p954_p0), %s892_s30, 128, %s890_s27, %s331_s28  }
  0xf9 PF: > { %s359_s29 = sand.u32 1, %s676_s9   ;;  %p955_p10 = scmp.ne.s32.totalorder %s947_s24, 0 }
  0xfa   : > { %p956_p12 = scmp.ge.s32.totalorder %s696_s14, 2  ;;  %s360_s16 = scalar_lea.sflag [#allocation4], %s359_s29 }
  0xfc   : > { %p488_p1 = pnand %p956_p12, %p955_p10 }
  0xfe   : > { %671 = dma.done.wait (!%p488_p1), %s360_s16, 128  }
  0xff   : > { %673 = vsyncadd (!%p488_p1), %s360_s16, 4294967168  ;;  %s21_s14 = sadd.s32 1, %s696_s14   ;;  %s957_s9 = smov %s680_s10 }
 0x100   : > { %p18_p2 = scmp.ge.s32.totalorder %s21_s14, 4   ;;  %s958_s10 = smov %s684_s11 }
 0x101   : > { %s959_s11 = smov %s776_s23  ;;  %s960_s12 = smov %s692_s13 }
 0x102   : > { %s961_s13 = smov %s963_s17  ;;  %20 = sbr.rel (!%p18_p2) target bundleno = 8 (0x8), region = 86 }
 0x109   :  { %365 = vsyncpa [#allocation3], 1 }
 0x10a   :  { %367 = vsyncpa [#allocation3 + $0x1], 1 }
 0x10b   :  { %368 = vsyncpa [#allocation6], 1 }
 0x10c   :  { %370 = vsyncpa [#allocation6 + $0x1], 1 }
 0x10d   :  { %371 = vsyncpa [#allocation4], 1 }
 0x10e   :  { %373 = vsyncpa [#allocation4 + $0x1], 1 }

</bundles_post_ra>
